<compile_context>
chip_gen: v7x
topology: tpu7x:2x2x1
jax: 0.10.0
libtpu: 0.0.40
codegen_flags: <defaults>
</compile_context>

<pallas_src>
import functools
import math

import jax
import jax.numpy as jnp
from jax.experimental import pallas as pl
from jax.experimental.pallas import tpu as pltpu


def _round_up(x, m):
    return (x + m - 1) // m * m


def highway_kernel(x_ref, w_ref, b_ref, o_ref, *, size_p, compute_dtype):
    layer = pl.program_id(1)

    # Initialize the resident activation (output block) from the input tile.
    @pl.when(layer == 0)
    def _():
        o_ref[...] = x_ref[...]

    h = o_ref[...]                                        # (TN, size_p) f32 carry

    # One fused MXU matmul for [gate | nonlinear | linear]: bf16 operands, f32 accum.
    z = jnp.dot(h.astype(compute_dtype), w_ref[0],
                preferred_element_type=jnp.float32) + b_ref[0]

    gate = jax.nn.sigmoid(z[:, :size_p])                    # EUP
    nonlinear = jnp.maximum(z[:, size_p:2 * size_p], 0.0)   # VPU
    linear = z[:, 2 * size_p:]

    # == gate*nonlinear + (1-gate)*linear, one fewer multiply.
    o_ref[...] = linear + gate * (nonlinear - linear)


def highway_forward(x, w_fused, b_fused, *, block_rows=512):
    """x: (..., size).
    w_fused: (L, size_p, 3*size_p) bf16 — pre-transposed, feature-padded,
             [gate | nonlinear | linear] concatenated on the output dim.
    b_fused: (L, 1, 3*size_p) f32."""
    orig_shape = x.shape
    orig_dtype = x.dtype
    size = orig_shape[-1]
    n = math.prod(orig_shape[:-1]) if len(orig_shape) > 1 else 1

    num_layers, size_p, size_p3 = w_fused.shape
    assert size_p3 == 3 * size_p and size_p % 128 == 0 and size_p >= size

    tn = min(block_rows, _round_up(n, 8))      # sublane-aligned row tile
    n_pad = _round_up(n, tn)

    x2 = x.reshape(n, size).astype(jnp.float32)
    x2 = jnp.pad(x2, ((0, n_pad - n), (0, size_p - size)))

    # VMEM budget: double-buffered bf16 weights + resident / double-buffered activations.
    w_bytes = size_p * 3 * size_p * jnp.dtype(w_fused.dtype).itemsize
    act_bytes = tn * size_p * 4
    vmem_est = 2 * w_bytes + 4 * act_bytes + 2 * 3 * size_p * 4 + (1 << 20)
    vmem_limit = int(min(vmem_est + (4 << 20), 100 << 20)) if vmem_est > (30 << 20) else None

    kernel = functools.partial(highway_kernel, size_p=size_p,
                               compute_dtype=w_fused.dtype)

    flops = (6 * n_pad * size_p * size_p + 8 * n_pad * size_p) * num_layers
    bytes_accessed = int(x2.size * 4 + n_pad * size_p * 4
                         + w_fused.size * jnp.dtype(w_fused.dtype).itemsize
                         + b_fused.size * 4)

    out = pl.pallas_call(
        kernel,
        out_shape=jax.ShapeDtypeStruct((n_pad, size_p), jnp.float32),
        grid_spec=pltpu.PrefetchScalarGridSpec(
            num_scalar_prefetch=0,
            grid=(n_pad // tn, num_layers),
            in_specs=[
                pl.BlockSpec((tn, size_p), lambda i, l: (i, 0)),                # x tile (resident per tile)
                pl.BlockSpec((1, size_p, 3 * size_p), lambda i, l: (l, 0, 0)),  # fused weights
                pl.BlockSpec((1, 1, 3 * size_p), lambda i, l: (l, 0, 0)),       # fused biases
            ],
            out_specs=pl.BlockSpec((tn, size_p), lambda i, l: (i, 0)),          # running activation
        ),
        compiler_params=pltpu.CompilerParams(
            dimension_semantics=("parallel", "arbitrary"),
            vmem_limit_bytes=vmem_limit),
        cost_estimate=pl.CostEstimate(
            flops=flops,
            transcendentals=n_pad * size_p * num_layers,
            bytes_accessed=bytes_accessed),
        input_output_aliases={0: 0},   # x2 is a fresh padded copy -> safe to donate
    )(x2, w_fused, b_fused)

    return out[:n, :size].astype(orig_dtype).reshape(orig_shape)


def init_params(key, size, num_layers):
    """Per-layer f32 parameters mimicking nn.Linear's U(-1/sqrt(size), 1/sqrt(size))."""
    bound = 1.0 / math.sqrt(size)
    ks = jax.random.split(key, 6)

    def u(k, shape):
        return jax.random.uniform(k, shape, jnp.float32, -bound, bound)

    wg = u(ks[0], (num_layers, size, size))   # (L, out, in), torch layout
    wn = u(ks[1], (num_layers, size, size))
    wl = u(ks[2], (num_layers, size, size))
    bg = u(ks[3], (num_layers, size))
    bn = u(ks[4], (num_layers, size))
    bl = u(ks[5], (num_layers, size))
    return wg, bg, wn, bn, wl, bl


def pack_params(params, *, weight_dtype=jnp.bfloat16):
    """Transpose to (in, out), pad the feature dim to a multiple of 128 and
    concatenate [gate | nonlinear | linear] along the output dim."""
    wg, bg, wn, bn, wl, bl = params
    num_layers, size, _ = wg.shape
    size_p = _round_up(size, 128)

    def pad_w(w):                      # (L, out, in) -> (L, size_p[in], size_p[out])
        wt = jnp.transpose(w, (0, 2, 1))
        return jnp.pad(wt, ((0, 0), (0, size_p - size), (0, size_p - size)))

    def pad_b(b):                      # (L, size) -> (L, size_p)
        return jnp.pad(b, ((0, 0), (0, size_p - size)))

    w_fused = jnp.concatenate([pad_w(wg), pad_w(wn), pad_w(wl)],
                              axis=-1).astype(weight_dtype)              # (L, size_p, 3*size_p)
    b_fused = jnp.concatenate([pad_b(bg), pad_b(bn), pad_b(bl)],
                              axis=-1)[:, None, :].astype(jnp.float32)   # (L, 1, 3*size_p)
    return w_fused, b_fused


def highway_ref_f32(x, params):
    """Pure-f32 reference with the exact PyTorch module semantics."""
    wg, bg, wn, bn, wl, bl = params
    h = x
    for l in range(wg.shape[0]):
        gate = jax.nn.sigmoid(h @ wg[l].T + bg[l])
        nonlinear = jax.nn.relu(h @ wn[l].T + bn[l])
        linear = h @ wl[l].T + bl[l]
        h = gate * nonlinear + (1.0 - gate) * linear
    return h


def highway_ref_packed(x_pad, w_fused, b_fused):
    """Reference mirroring the kernel numerics (bf16 matmul operands, f32 accum)."""
    size_p = w_fused.shape[1]
    h = x_pad.astype(jnp.float32)
    for l in range(w_fused.shape[0]):
        z = jnp.dot(h.astype(w_fused.dtype), w_fused[l],
                    preferred_element_type=jnp.float32) + b_fused[l]
        gate = jax.nn.sigmoid(z[:, :size_p])
        nonlinear = jnp.maximum(z[:, size_p:2 * size_p], 0.0)
        linear = z[:, 2 * size_p:]
        h = linear + gate * (nonlinear - linear)
    return h


if __name__ == "__main__":
    key = jax.random.PRNGKey(0)
    size = 32
    num_layers = 3
    batch, seq = 2, 8

    k_x, k_p = jax.random.split(key)
    x = jax.random.normal(k_x, (batch, seq, size), jnp.float32)
    params = init_params(k_p, size, num_layers)
    w_fused, b_fused = pack_params(params, weight_dtype=jnp.bfloat16)

    out = highway_forward(x, w_fused, b_fused)
    out = jax.block_until_ready(out)
    assert out.shape == x.shape

    # Tight check against a reference that mirrors the kernel's bf16-matmul numerics.
    n = batch * seq
    size_p = w_fused.shape[1]
    x_pad = jnp.pad(x.reshape(n, size), ((0, 0), (0, size_p - size)))
    ref_mirror = highway_ref_packed(x_pad, w_fused, b_fused)[:, :size].reshape(x.shape)
    assert jnp.allclose(out, ref_mirror, atol=1e-4, rtol=1e-4), "mismatch vs bf16-mirror reference"

    # Loose sanity check against the pure-f32 module semantics
    # (bf16 MXU operands introduce ~1e-3-scale differences).
    ref_f32 = highway_ref_f32(x.reshape(n, size), params).reshape(x.shape)
    assert jnp.allclose(out, ref_f32, atol=5e-2, rtol=5e-2), "mismatch vs f32 reference"

    print("KERNEL_OK")
</pallas_src>

<mosaic_0001>
module attributes {stable_mosaic.version = 11 : i64} {
  func.func @highway_kernel(%arg0: i32, %arg1: i32, %arg2: memref<16x128xf32, #tpu.memory_space<vmem>>, %arg3: memref<1x128x384xbf16, #tpu.memory_space<vmem>>, %arg4: memref<1x1x384xf32, #tpu.memory_space<vmem>>, %arg5: memref<16x128xf32, #tpu.memory_space<vmem>>) attributes {dimension_semantics = [#tpu.dimension_semantics<parallel>, #tpu.dimension_semantics<arbitrary>], iteration_bounds = array<i64: 1, 3>, scalar_prefetch = 0 : i64, scratch_operands = 0 : i64, tpu.core_type = #tpu.core_type<tc>, window_params = [{transform_indices = @transform_0, window_bounds = array<i64: 16, 128>}, {transform_indices = @transform_1, window_bounds = array<i64: 1, 128, 384>}, {transform_indices = @transform_2, window_bounds = array<i64: 1, 1, 384>}, {transform_indices = @transform_3, window_bounds = array<i64: 16, 128>}]} {
    %c0_i32 = arith.constant 0 : i32
    %0 = arith.cmpi eq, %arg1, %c0_i32 : i32
    %1 = arith.extui %0 : i1 to i32
    %c0_i32_0 = arith.constant 0 : i32
    %2 = arith.cmpi ne, %1, %c0_i32_0 : i32
    scf.if %2 {
      %c0_12 = arith.constant 0 : index
      %c0_13 = arith.constant 0 : index
      %26 = vector.load %arg2[%c0_12, %c0_13] : memref<16x128xf32, #tpu.memory_space<vmem>>, vector<16x128xf32>
      %c0_14 = arith.constant 0 : index
      %c0_15 = arith.constant 0 : index
      %27 = vector.load %arg5[%c0_14, %c0_15] : memref<16x128xf32, #tpu.memory_space<vmem>>, vector<16x128xf32>
      tpu.vector_store %arg5[%c0_14, %c0_15], %26 {strides = array<i32>} : memref<16x128xf32, #tpu.memory_space<vmem>>, vector<16x128xf32>,
    } else {
    }
    %c0 = arith.constant 0 : index
    %c0_1 = arith.constant 0 : index
    %3 = vector.load %arg5[%c0, %c0_1] : memref<16x128xf32, #tpu.memory_space<vmem>>, vector<16x128xf32>
    %4 = arith.truncf %3 : vector<16x128xf32> to vector<16x128xbf16>
    %c0_2 = arith.constant 0 : index
    %c0_3 = arith.constant 0 : index
    %c0_4 = arith.constant 0 : index
    %5 = vector.load %arg3[%c0_2, %c0_3, %c0_4] : memref<1x128x384xbf16, #tpu.memory_space<vmem>>, vector<1x128x384xbf16>
    %6 = vector.shape_cast %5 : vector<1x128x384xbf16> to vector<128x384xbf16>
    %cst = arith.constant dense<0.000000e+00> : vector<16x384xf32>
    %7 = tpu.matmul %4, %6, %cst {dimension_numbers = #tpu.dot_dimension_numbers<[1], [0], [0], [1], [0, 0, 1, 1], [], []>} : vector<16x128xbf16>, vector<128x384xbf16>, vector<16x384xf32> -> vector<16x384xf32>
    %c0_5 = arith.constant 0 : index
    %c0_6 = arith.constant 0 : index
    %c0_7 = arith.constant 0 : index
    %8 = vector.load %arg4[%c0_5, %c0_6, %c0_7] : memref<1x1x384xf32, #tpu.memory_space<vmem>>, vector<1x1x384xf32>
    %9 = vector.shape_cast %8 : vector<1x1x384xf32> to vector<1x384xf32>
    %10 = vector.broadcast %9 : vector<1x384xf32> to vector<16x384xf32>
    %11 = arith.addf %7, %10 : vector<16x384xf32>
    %12 = vector.extract_strided_slice %11 {offsets = [0, 0], sizes = [16, 128], strides = [1, 1]} : vector<16x384xf32> to vector<16x128xf32>
    %13 = arith.negf %12 : vector<16x128xf32>
    %14 = math.exp %13 : vector<16x128xf32>
    %cst_8 = arith.constant 1.000000e+00 : f32
    %15 = vector.broadcast %cst_8 : f32 to vector<16x128xf32>
    %16 = arith.addf %15, %14 : vector<16x128xf32>
    %17 = arith.divf %15, %16 : vector<16x128xf32>
    %18 = vector.extract_strided_slice %11 {offsets = [0, 128], sizes = [16, 128], strides = [1, 1]} : vector<16x384xf32> to vector<16x128xf32>
    %cst_9 = arith.constant 0.000000e+00 : f32
    %19 = vector.broadcast %cst_9 : f32 to vector<16x128xf32>
    %20 = arith.maximumf %18, %19 : vector<16x128xf32>
    %21 = vector.extract_strided_slice %11 {offsets = [0, 256], sizes = [16, 128], strides = [1, 1]} : vector<16x384xf32> to vector<16x128xf32>
    %22 = arith.subf %20, %21 : vector<16x128xf32>
    %23 = arith.mulf %17, %22 : vector<16x128xf32>
    %24 = arith.addf %21, %23 : vector<16x128xf32>
    %c0_10 = arith.constant 0 : index
    %c0_11 = arith.constant 0 : index
    %25 = vector.load %arg5[%c0_10, %c0_11] : memref<16x128xf32, #tpu.memory_space<vmem>>, vector<16x128xf32>
    tpu.vector_store %arg5[%c0_10, %c0_11], %24 {strides = array<i32>} : memref<16x128xf32, #tpu.memory_space<vmem>>, vector<16x128xf32>,
    return
  }
  func.func @transform_0(%arg0: i32, %arg1: i32) -> (i32, i32) {
    %c0_i32 = arith.constant 0 : i32
    %c0_i32_0 = arith.constant 0 : i32
    return %arg0, %c0_i32 : i32, i32
  }
  func.func @transform_1(%arg0: i32, %arg1: i32) -> (i32, i32, i32) {
    %c0_i32 = arith.constant 0 : i32
    %c0_i32_0 = arith.constant 0 : i32
    %c0_i32_1 = arith.constant 0 : i32
    return %arg1, %c0_i32, %c0_i32_0 : i32, i32, i32
  }
  func.func @transform_2(%arg0: i32, %arg1: i32) -> (i32, i32, i32) {
    %c0_i32 = arith.constant 0 : i32
    %c0_i32_0 = arith.constant 0 : i32
    %c0_i32_1 = arith.constant 0 : i32
    return %arg1, %c0_i32, %c0_i32_0 : i32, i32, i32
  }
  func.func @transform_3(%arg0: i32, %arg1: i32) -> (i32, i32) {
    %c0_i32 = arith.constant 0 : i32
    %c0_i32_0 = arith.constant 0 : i32
    return %arg0, %c0_i32 : i32, i32
  }
}

</mosaic_0001>

<bundles_post_ra>
// kernel: tpu_custom_call.1
= control target key start
LH: loop header
LB: loop body
LE: loop exit
PB: predicated region body
PF: predicated region fallthrough
CT: control target
= control target key end

     0   :  { %8 = vsyncpa [#allocation3], 0  ;;  %s1217_s0 = inlined_call_operand.hbm [shape: f32[16,128], index: 0, kind: input, shape index: {}, may-alias: {0,3}]   ;;  %s1218_s1 = inlined_call_operand.hbm [shape: bf16[3,128,384], index: 1, kind: input, shape index: {}]   ;;  %s1219_s2 = inlined_call_operand.vmem [shape: f32[3,1,384], index: 2, kind: input, shape index: {}]   ;;  %s1220_s3 = inlined_call_operand.hbm [shape: f32[16,128], index: 3, kind: output, shape index: {}, may-alias: {0,3}]  }
   0x1   :  { %9 = vsyncpa [#allocation6], 0 }
   0x2   :  { %11 = vsyncpa [#allocation6 + $0x1], 0 }
   0x3   :  { %12 = vsyncpa [#allocation4], 0  ;;  %s999_s12 = smov 0   ;;  %s1001_s13 = smov 0  }
   0x4   :  { %s1003_s14 = smov 0   ;;  %s1005_s15 = smov 0  }
   0x5   :  { %s1007_s16 = smov 0   ;;  %s1009_s17 = smov 0  }
   0x6 LB: > { %s630_s18 = sadd.s32 4294967295, %s965_s17   ;;  %p76_p0 = scmp.ne.s32.totalorder %s949_s13, %s945_s12  ;;  %s965_s17 = sphi %s1009_s17, %s18_s17   ;;  %s961_s16 = sphi %s1007_s16, %s1238_s16   ;;  %s957_s15 = sphi %s1005_s15, %s1237_s15   ;;  %s953_s14 = sphi %s1003_s14, %s1236_s14   ;;  %s949_s13 = sphi %s1001_s13, %s1235_s13   ;;  %s945_s12 = sphi %s999_s12, %s1234_s12  }
   0x7   : > { %p1031_p1 = scmp.eq.s32.totalorder %s630_s18, 0  ;;  %p631_p2 = scmp.ge.s32.totalorder %s965_s17, 1 }
   0x8   : > { %p139_p3 = scmp.lt.s32.totalorder %s965_s17, 4  ;;  %s967_s22 = smov [#allocation2]  }
   0x9   : > { %s1225_s19 = scalar_select %p1031_p1, 1, 0 }
   0xa   : > { %p1039_p4 = por %p1031_p1, %p76_p0  ;;  %p1043_p5 = pnand %p631_p2, %p139_p3 }
   0xb   : > { %s154_s23 = sshll.u32 %s967_s22, 4  ;;  %s27_s25 = sadd.s32 1, %s961_s16  ;;  %s155_s23 = int_to_ptr.vmem [resolvable:$true] %s154_s23 }
   0xc   : > { %s1226_s20 = scalar_select %p1039_p4, 1, 0 }
   0xd   : > { %s1227_s21 = scalar_select %p1043_p5, 1, 0 }
   0xe   : > { %p711_p6 = pneg %p1043_p5  ;;  %s823_s28 = scalar_lea.hbm %s1217_s0, 256 }
   0xf   : > { %p824_p8 = scmp.ne.s32.totalorder %s1217_s0, %s823_s28  ;;  %p830_p12 = scmp.lt.u32.totalorder %s823_s28, %s1217_s0 }
  0x10   : > { %p1051_p7 = pnand %p711_p6, %p1031_p1 }
  0x12   : > { %p825_p9 = pneg %p1051_p7 }
  0x14   : > { %p826_p10 = pnand %p825_p9, %p824_p8 }
  0x16   : > { %p827_p11 = pneg %p826_p10 }
  0x18   : > { %p832_p13 = pnand %p830_p12, %p827_p11 }
  0x1a   : > { %835 = shalt.err (!%p832_p13)
}
  0x1b   : > { %s836_s6 = scalar_lea.vmem %s155_s23, 256  ;;  %p844_p6 = scmp.lt.s32.totalorder %s155_s23, %s155_s23 }
  0x1c   : > { %p837_p0 = scmp.ne.s32.totalorder %s155_s23, %s836_s6  ;;  %p845_p4 = scmp.lt.s32.totalorder %s836_s6, %s836_s6 }
  0x1e   : > { %p839_p2 = pnand %p837_p0, %p825_p9  ;;  %p846_p1 = por %p845_p4, %p844_p6 }
  0x20   : > { %p840_p3 = pneg %p839_p2 }
  0x22   : > { %p847_p5 = pnand %p846_p1, %p840_p3 }
  0x24   : > { %850 = shalt.err (!%p847_p5)
}
  0x25   : > { %s968_s7 = smov 128   ;;  %s969_s8 = smov 8  }
  0x26   : > { %714 = dma.hbm_to_vmem [thread:$0]  (!%p1051_p7), %s1217_s0, 256, %s155_s23, [#allocation3], %s968_s7, %s968_s7, %s969_s8  }
  0x27   : > { %p28_p4 = scmp.ge.s32.totalorder %s27_s25, 3  ;;  %s63_s11 = sadd.s32 1, %s953_s14 }
  0x28   : > { %p70_p1 = scmp.ne.s32.totalorder %s953_s14, %s949_s13  ;;  %p71_p5 = scmp.eq.s32.totalorder %s965_s17, 0 }
  0x29   : > { %s1240_s25 = smov (%p28_p4, %s27_s25), 0  ;;  %p720_p9 = scmp.lt.s32.totalorder %s965_s17, 3 }
  0x2a   : > { %p72_p8 = por %p71_p5, %p70_p1  ;;  %s60_s12 = ssub.s32 %s961_s16, %s1240_s25 }
  0x2b   : > { %s168_s22 = sand.u32 1, %s953_s14   ;;  %p61_p10 = scmp.eq.s32.totalorder %s60_s12, 0 }
  0x2c   : > { %s697_s26 = smul.u32 192, %s168_s22  ;;  %p1082_p11 = pnand %p720_p9, %p72_p8 }
  0x2d   : > { %s1087_s23 = scalar_select %p61_p10, %s953_s14, %s63_s11  }
  0x2e   : > { %s698_s24 = smul.u32 3072, %s961_s16  ;;  %s172_s28 = scalar_lea.vmem [#allocation5], %s697_s26 }
  0x2f   : > { %s179_s29 = sshll.u32 %s172_s28, 4  ;;  %s1097_s6 = scalar_lea.sflag [#allocation6], %s168_s22  ;;  %s1095_s29 = int_to_ptr.vmem [resolvable:$true] %s179_s29 }
  0x30   : > { %s1093_s5 = scalar_lea.hbm %s1218_s1, %s698_s24  ;;  %p853_p12 = pneg %p1082_p11 }
  0x31   : > { %s851_s7 = scalar_lea.hbm %s1093_s5, 3072  ;;  %s856_s10 = scalar_lea.hbm %s1218_s1, 9216 }
  0x32   : > { %p852_p7 = scmp.ne.s32.totalorder %s1093_s5, %s851_s7  ;;  %p857_p2 = scmp.lt.u32.totalorder %s1093_s5, %s1218_s1 }
  0x33   : > { %p858_p3 = scmp.lt.u32.totalorder %s856_s10, %s851_s7  ;;  %p860_p4 = scmp.lt.u32.totalorder %s851_s7, %s1093_s5 }
  0x34   : > { %p854_p13 = pnand %p853_p12, %p852_p7 }
  0x35   : > { %p859_p6 = por %p858_p3, %p857_p2 }
  0x36   : > { %p855_p0 = pneg %p854_p13 }
  0x37   : > { %p861_p1 = por %p860_p4, %p859_p6 }
  0x39   : > { %p862_p5 = pnand %p861_p1, %p855_p0 }
  0x3b   : > { %865 = shalt.err (!%p862_p5)
}
  0x3c   : > { %s866_s22 = scalar_lea.vmem %s1095_s29, 3072  ;;  %s970_s26 = smov [#allocation5]  }
  0x3d   : > { %p867_p8 = scmp.ne.s32.totalorder %s1095_s29, %s866_s22  ;;  %s871_s24 = sshll.u32 %s970_s26, 4  ;;  %s872_s24 = int_to_ptr.vmem [resolvable:$false] %s871_s24 }
  0x3e   : > { %s873_s28 = scalar_lea.vmem %s872_s24, 6144  ;;  %p874_p7 = scmp.lt.s32.totalorder %s1095_s29, %s872_s24 }
  0x3f   : > { %p869_p9 = pnand %p867_p8, %p853_p12  ;;  %p875_p13 = scmp.lt.s32.totalorder %s873_s28, %s866_s22 }
  0x41   : > { %p870_p10 = pneg %p869_p9  ;;  %p876_p2 = por %p875_p13, %p874_p7 }
  0x43   : > { %p877_p3 = pnand %p876_p2, %p870_p10 }
  0x45   : > { %880 = shalt.err (!%p877_p3)
}
  0x46   : > { %s971_s30 = smov 192   ;;  %s972_s4 = smov 12  }
  0x47   : > { %718 = dma.hbm_to_vmem [thread:$0]  (!%p1082_p11), %s1093_s5, 3072, %s1095_s29, %s1097_s6, %s971_s30, %s971_s30, %s972_s4  }
  0x48   : > { %p1230_p12 = scmp.ne.s32.totalorder %s1227_s21, 0 }
  0x49   : > { %p1231_p0 = scmp.ne.s32.totalorder (!%p1230_p12), %s1225_s19, 0 }
  0x4a   : > { %198 = sbr.rel (%p1230_p12) target bundleno = 393 (0x189), region = 32 }
  0x51   : > { %932 = dma.done.wait (%p1231_p0), [#allocation3], 256  }
  0x52   : > { %934 = vsyncadd (%p1231_p0), [#allocation3], 4294967040  ;;  %s204_s7 = sand.u32 1, %s949_s13   ;;  %p1232_p6 = scmp.ne.s32.totalorder %s1226_s20, 0 }
  0x53   : > { %s699_s8 = smul.u32 192, %s204_s7  ;;  %s205_s9 = scalar_lea.sflag [#allocation6], %s204_s7 }
  0x55   : > { %s1132_s10 = scalar_lea.vmem [#allocation5], %s699_s8 }
  0x56   : > { %936 = dma.done.wait (%p1232_p6), %s205_s9, 3072  }
  0x57   : > { %938 = vsyncadd (%p1232_p6), %s205_s9, 4294964224  ;;  %p231_p11 = scmp.lt.s32.totalorder %s957_s15, 2  ;;  %p637_p4 = scmp.ne.s32.totalorder %s957_s15, 0 }
  0x58   : > { %v241_v0 = vld [vmem:[#allocation2] sm:$0xff] (!%p637_p4)  ;;  %v242_v1 = vld [vmem:[#allocation2 + $0x8] sm:$0xff] (!%p637_p4) }
  0x59   : > { %s232_s21 = scalar_select %p231_p11, %s957_s15, 2 }
  0x5a   : > { %240 = sbr.rel (%p637_p4) target bundleno = 97 (0x61), region = 44  ;;  %243 = vst [vmem:[#allocation7] sm:$0xff] (!%p637_p4), %v241_v0  ;;  %244 = vst [vmem:[#allocation7 + $0x8] sm:$0xff] (!%p637_p4), %v242_v1 }
  0x5b   : > { %s700_s27 = smul.u32 3, %s232_s21 }
  0x5d   : > { %s1143_s5 = scalar_lea.vmem %s1219_s2, %s700_s27 }
  0x61 PF: > { %v783_v2 = vld [vmem:[%s1132_s10 + $0x4] ss:$12 sps:$4 sm:$0xff]   ;;  %v785_v3 = vld [vmem:[%s1132_s10] ss:$12 sps:$4 sm:$0xff]   ;;  %v973_v4 = vmov 0.0   ;;  %v974_v5 = vmov 0   ;;  %v282_v31 = vlaneseq }
  0x62   : > { %677 = vmatprep.subr.bf16.mxu1 %v973_v4  ;;  %457 = vmatprep.mubr.bf16.mxu0 %v974_v5  ;;  %v786_v6 = vld [vmem:[%s1132_s10 + $0x1c] ss:$12 sps:$4 sm:$0xff]   ;;  %vm975_vm0 = vmmov 0   ;;  %v789_v8 = vld [vmem:[%s1132_s10 + $0x18] ss:$12 sps:$4 sm:$0xff]   ;;  %s976_s15 = smov [#allocation7]  }
  0x63   : > { %425 = vmatprep.subr.bf16.mxu0 %v783_v2  ;;  %693 = vmatprep.mubr.msk.bf16.mxu1 %vm975_vm0, %v973_v4  ;;  %v788_v7 = vld [vmem:[%s1132_s10 + $0x8] ss:$12 sps:$4 sm:$0xff]   ;;  %v792_v10 = vld [vmem:[%s1132_s10 + $0x20] ss:$12 sps:$4 sm:$0xff]   ;;  %v793_v11 = vld [vmem:[%s1132_s10 + $0x30] ss:$12 sps:$4 sm:$0xff]  }
  0x64   : > { %426 = vmatpush1.bf16.msra.mxu0 %v785_v3  ;;  %v790_v9 = vld [vmem:[%s1132_s10 + $0x34] ss:$12 sps:$4 sm:$0xff]   ;;  %678 = vmatpush3.bf16.msra.mxu1 %v788_v7  ;;  %v794_v12 = vld [vmem:[%s1132_s10 + $0x4c] ss:$12 sps:$4 sm:$0xff]   ;;  %v798_v15 = vld [vmem:[%s1132_s10 + $0x64] ss:$12 sps:$4 sm:$0xff]  }
  0x65   : > { %427 = vmatprep.subr.bf16.mxu0 %v786_v6  ;;  %679 = vmatprep.subr.bf16.mxu1 %v973_v4  ;;  %v796_v13 = vld [vmem:[%s1132_s10 + $0x38] ss:$12 sps:$4 sm:$0xff]   ;;  %v797_v14 = vld [vmem:[%s1132_s10 + $0x48] ss:$12 sps:$4 sm:$0xff]   ;;  %v800_v16 = vld [vmem:[%s1132_s10 + $0x50] ss:$12 sps:$4 sm:$0xff]  }
  0x66   : > { %v801_v17 = vld [vmem:[%s1132_s10 + $0x60] ss:$12 sps:$4 sm:$0xff]   ;;  %v802_v18 = vld [vmem:[%s1132_s10 + $0x7c] ss:$12 sps:$4 sm:$0xff]   ;;  %v805_v20 = vld [vmem:[%s1132_s10 + $0x78] ss:$12 sps:$4 sm:$0xff]  }
  0x67   : > { %v804_v19 = vld [vmem:[%s1132_s10 + $0x68] ss:$12 sps:$4 sm:$0xff]   ;;  %v808_v22 = vld [vmem:[%s1132_s10 + $0x80] ss:$12 sps:$4 sm:$0xff]   ;;  %v809_v23 = vld [vmem:[%s1132_s10 + $0x90] ss:$12 sps:$4 sm:$0xff]  }
  0x68   : > { %428 = vmatpush1.bf16.msra.mxu0 %v789_v8  ;;  %680 = vmatpush3.bf16.msra.mxu1 %v792_v10  ;;  %v806_v21 = vld [vmem:[%s1132_s10 + $0x94] ss:$12 sps:$4 sm:$0xff]   ;;  %v810_v24 = vld [vmem:[%s1132_s10 + $0xac] ss:$12 sps:$4 sm:$0xff]   ;;  %v814_v29 = vld [vmem:[%s1132_s10 + $0xb0] ss:$12 sps:$4 sm:$0xff]  }
  0x69   : > { %429 = vmatprep.subr.bf16.mxu0 %v790_v9  ;;  %681 = vmatprep.subr.bf16.mxu1 %v973_v4  ;;  %v812_v25 = vld [vmem:[%s1132_s10 + $0x98] ss:$12 sps:$4 sm:$0xff]   ;;  %v813_v26 = vld [vmem:[%s1132_s10 + $0xa8] ss:$12 sps:$4 sm:$0xff]   ;;  %v283_v32 = vshrl.u32 %v282_v31, 7  ;;  %s540_s20 = sshll.u32 %s976_s15, 4  ;;  %s541_s20 = int_to_ptr.vmem [resolvable:$true] %s540_s20 }
  0x6a   : > { %v245_v27 = vld [vmem:[#allocation7] sm:$0xff]  ;;  %v246_v28 = vld [vmem:[#allocation7 + $0x8] sm:$0xff]  ;;  %v280_v34 = vld [vmem:[%s1143_s5] sm:$0x7]  ;;  %p1173_p1 = scmp.eq.s32.totalorder %s630_s18, 2  ;;  %s881_s11 = scalar_lea.vmem %s541_s20, 256 }
  0x6b   : > { %v247_v30 = vpack.c.bf16 %v246_v28, %v245_v27  ;;  %v284_v33 = vsub.s32 0, %v283_v32  ;;  %v288_v35 = vsub.s32 1, %v283_v32  ;;  %v292_v36 = vsub.s32 2, %v283_v32  ;;  %p882_p5 = scmp.ne.s32.totalorder %s541_s20, %s881_s11  ;;  %p888_p10 = scmp.lt.s32.totalorder %s541_s20, %s541_s20 }
  0x6c   : > { %430 = vmatpush1.bf16.msra.mxu0 %v793_v11  ;;  %682 = vmatpush3.bf16.msra.mxu1 %v796_v13  ;;  %p889_p7 = scmp.lt.s32.totalorder %s881_s11, %s881_s11 }
  0x6d   : > { %431 = vmatprep.subr.bf16.mxu0 %v794_v12  ;;  %683 = vmatprep.subr.bf16.mxu1 %v973_v4  ;;  %v285_v37 = vrot.slane %v280_v34, %v284_v33  ;;  %v289_v38 = vrot.slane %v280_v34, %v288_v35  ;;  %v293_v39 = vrot.slane %v280_v34, %v292_v36  ;;  %p883_p8 = pnand %p882_p5, %p1173_p1 }
  0x6e   : > { %p890_p13 = por %p889_p7, %p888_p10 }
  0x6f   : > { %p884_p9 = pneg %p883_p8 }
  0x70   : > { %432 = vmatpush1.bf16.msra.mxu0 %v797_v14  ;;  %684 = vmatpush3.bf16.msra.mxu1 %v800_v16 }
  0x71   : > { %433 = vmatprep.subr.bf16.mxu0 %v798_v15  ;;  %685 = vmatprep.subr.bf16.mxu1 %v973_v4  ;;  %p891_p2 = pnand %p890_p13, %p884_p9 }
  0x74   : > { %434 = vmatpush1.bf16.msra.mxu0 %v801_v17  ;;  %686 = vmatpush3.bf16.msra.mxu1 %v804_v19 }
  0x75   : > { %435 = vmatprep.subr.bf16.mxu0 %v802_v18  ;;  %687 = vmatprep.subr.bf16.mxu1 %v973_v4 }
  0x78   : > { %436 = vmatpush1.bf16.msra.mxu0 %v805_v20  ;;  %688 = vmatpush3.bf16.msra.mxu1 %v808_v22 }
  0x79   : > { %437 = vmatprep.subr.bf16.mxu0 %v806_v21  ;;  %689 = vmatprep.subr.bf16.mxu1 %v973_v4 }
  0x7c   : > { %438 = vmatpush1.bf16.msra.mxu0 %v809_v23  ;;  %690 = vmatpush3.bf16.msra.mxu1 %v812_v25 }
  0x7d   : > { %439 = vmatprep.subr.bf16.mxu0 %v810_v24  ;;  %691 = vmatprep.subr.bf16.mxu1 %v973_v4 }
  0x80   : > { %440 = vmatpush1.bf16.msra.mxu0 %v813_v26  ;;  %692 = vmatpush3.bf16.msra.mxu1 %v814_v29 }
  0x83   : > { %458 = vmatmul.mubr.bf16.vlgmr.msra.gmra.mrb[0].mxu0 %v247_v30  ;;  %694 = vmatmul.mubr.bf16.vlgmr.msra.gmra.mrb[0].mxu1 %v247_v30 }
 0x156   : > { %v459_v40 = vpop.f32.mrb[0].mxu0  ;;  %v502_v45 = vpop.f32.mrb[0].mxu1 }
 0x157   : > { %v460_v41 = vadd.f32 %v459_v40, %v285_v37  ;;  %v461_v42 = vpop.f32.mrb[1].mxu0  ;;  %v503_v49 = vadd.f32 %v502_v45, %v293_v39  ;;  %v695_v50 = vpop.f32.mrb[1].mxu1 }
 0x158   : > { %v462_v43 = vadd.f32 %v461_v42, %v289_v38  ;;  %v463_v44 = vpop.f32.mrb[2].mxu0  ;;  %v505_v53 = vpop.f32.mrb[2].mxu1 }
 0x159   : > { %v662_v46 = vmul.f32 -1.442695, %v460_v41  ;;  %v464_v47 = vadd.f32 %v463_v44, %v285_v37  ;;  %v465_v48 = vpop.f32.mrb[3].mxu0  ;;  %v506_v55 = vadd.f32 %v505_v53, %v293_v39  ;;  %v696_v56 = vpop.f32.mrb[3].mxu1 }
 0x15a   : > { %v521_v51 = vmax.f32 %v462_v43, 0.0  ;;  %v466_v52 = vadd.f32 %v465_v48, %v289_v38 }
 0x15b   : > { %815 = vpow2.f32 %v662_v46  ;;  %v663_v54 = vmul.f32 -1.442695, %v464_v47 }
 0x15c   : > { %v522_v57 = vmax.f32 %v466_v52, 0.0  ;;  %v523_v58 = vsub.f32 %v521_v51, %v503_v49 }
 0x15d   : > { %817 = vpow2.f32 %v663_v54 }
 0x15e   : > { %v524_v59 = vsub.f32 %v522_v57, %v506_v55 }
 0x165   : > { %v816_v60 = vpop.eup %815 }
 0x166   : > { %v515_v61 = vadd.f32 1.0, %v816_v60 }
 0x167   : > { %v818_v62 = vpop.eup %817 }
 0x168   : > { %819 = vrcp.f32 %v515_v61  ;;  %v516_v63 = vadd.f32 1.0, %v818_v62 }
 0x16a   : > { %821 = vrcp.f32 %v516_v63 }
 0x172   : > { %v820_v0 = vpop.eup %819 }
 0x173   : > { %v525_v1 = vmul.f32 %v820_v0, %v523_v58 }
 0x174   : > { %v822_v2 = vpop.eup %821 }
 0x175   : > { %v527_v3 = vadd.f32 %v525_v1, %v503_v49  ;;  %v526_v4 = vmul.f32 %v822_v2, %v524_v59 }
 0x177   : > { %529 = vst [vmem:[#allocation7] sm:$0xff] %v527_v3  ;;  %v528_v5 = vadd.f32 %v526_v4, %v506_v55 }
 0x179   : > { %530 = vst [vmem:[#allocation7 + $0x8] sm:$0xff] %v528_v5 }
 0x17a   : > { %894 = shalt.err (!%p891_p2)
}
 0x17b   : > { %s895_s22 = scalar_lea.hbm %s1220_s3, 256 }
 0x17c   : > { %p896_p3 = scmp.ne.s32.totalorder %s1220_s3, %s895_s22  ;;  %p901_p6 = scmp.lt.u32.totalorder %s895_s22, %s1220_s3 }
 0x17e   : > { %p897_p12 = pnand %p896_p3, %p1173_p1 }
 0x180   : > { %p898_p0 = pneg %p897_p12 }
 0x182   : > { %p903_p11 = pnand %p901_p6, %p898_p0 }
 0x184   : > { %906 = shalt.err (!%p903_p11)
}
 0x185   : > { %s977_s4 = smov 128   ;;  %s978_s7 = smov 8  }
 0x186   : > { %708 = dma.vmem_to_hbm [thread:$0]  (%p1173_p1), %s541_s20, 256, %s1220_s3, [#allocation4], %s977_s4, %s977_s4, %s978_s7  }
 0x187   : > { %940 = dma.done.wait (%p1173_p1), [#allocation4], 256  }
 0x188   : > { %942 = vsyncadd (%p1173_p1), [#allocation4], 4294967040 }
 0x189 PF: > { %s18_s17 = sadd.s32 1, %s965_s17   ;;  %s1234_s12 = smov %s949_s13 }
 0x18a   : > { %p15_p4 = scmp.ge.s32.totalorder %s18_s17, 5   ;;  %s1235_s13 = smov %s953_s14 }
 0x18b   : > { %s1236_s14 = smov %s1087_s23  ;;  %s1237_s15 = smov %s961_s16 }
 0x18c   : > { %s1238_s16 = smov %s1240_s25  ;;  %17 = sbr.rel (!%p15_p4) target bundleno = 6 (0x6), region = 83 }
 0x193   :  { %556 = vsyncpa [#allocation3], 1 }
 0x194   :  { %558 = vsyncpa [#allocation3 + $0x1], 1 }
 0x195   :  { %559 = vsyncpa [#allocation6], 1 }
 0x196   :  { %561 = vsyncpa [#allocation6 + $0x1], 1 }
 0x197   :  { %562 = vsyncpa [#allocation4], 1 }
 0x198   :  { %564 = vsyncpa [#allocation4 + $0x1], 1 }

</bundles_post_ra>
